<compile_context>
chip_gen: v5e
topology: v5e:2x2
jax: 0.10.0
libtpu: 0.0.40
codegen_flags: <defaults>
</compile_context>

<pallas_src>
import functools

import jax
import jax.numpy as jnp
from jax.experimental import pallas as pl
from jax.experimental.pallas import tpu as pltpu


def _round_up(x, m):
    return (x + m - 1) // m * m


def _pick_b_tile(B, b_tile):
    """Batch tile: multiple of 8, and >=2 grid steps whenever B allows it."""
    bt = max(8, _round_up(min(b_tile, _round_up(B, 8)), 8))
    if B > 8 and _round_up(B, bt) // bt < 2:
        bt = _round_up(-(-B // 2), 8)          # ceil(B/2) rounded to 8
    return bt


# ---------------------------------------------------------------------------
# Kernels
# ---------------------------------------------------------------------------

def _ensemble_blockdiag_kernel(x_ref, w1c_ref, b1c_ref, w2bd_ref, b2c_ref,
                               o_ref, h_scr):
    # x_ref:    (b_tile, Dinp)     shared batch tile (vmap in_dims=None)
    # w1c_ref:  (Dinp, E*Hp)       layer-1 weights, lane-concat over members
    # b1c_ref:  (1, E*Hp)          f32
    # w2bd_ref: (E*Hp, Np)         layer-2 as block-diagonal matrix
    # b2c_ref:  (1, Np)            f32
    # o_ref:    (b_tile, Np)       lane-dense output slab (Np = rnd128(E*D_out))
    # h_scr:    (b_tile, E*Hp)     VMEM staging for layer-1 activations
    h = jnp.dot(x_ref[...], w1c_ref[...], preferred_element_type=jnp.float32)
    h = jnp.maximum(h + b1c_ref[...].astype(jnp.float32), 0.0)   # f32 VPU
    h_scr[...] = h.astype(h_scr.dtype)

    out = jnp.dot(h_scr[...], w2bd_ref[...], preferred_element_type=jnp.float32)
    o_ref[...] = (out + b2c_ref[...].astype(jnp.float32)).astype(o_ref.dtype)


def _ensemble_permember_kernel(x_ref, w1c_ref, b1c_ref, w2_ref, b2_ref,
                               o_ref, h_scr, *, n_members, hp):
    # w2_ref: (E, Hp, Dp)   b2_ref: (E, 1, Dp)   o_ref: (E, b_tile, Dp)
    h = jnp.dot(x_ref[...], w1c_ref[...], preferred_element_type=jnp.float32)
    h = jnp.maximum(h + b1c_ref[...].astype(jnp.float32), 0.0)
    h_scr[...] = h.astype(h_scr.dtype)

    for e in range(n_members):                      # static unroll, E is small
        h_e = h_scr[:, e * hp:(e + 1) * hp]         # 128-lane aligned slice
        out_e = jnp.dot(h_e, w2_ref[e], preferred_element_type=jnp.float32)
        out_e = out_e + b2_ref[e].astype(jnp.float32)
        o_ref[e] = out_e.astype(o_ref.dtype)        # direct (E, B, Dp) store


# ---------------------------------------------------------------------------
# Wrapper
# ---------------------------------------------------------------------------

def ensemble_forward(x, w1, b1, w2, b2, *, b_tile=256, mxu_dtype=None):
    """out[e] = ReLU(x @ w1[e] + b1[e]) @ w2[e] + b2[e]; out shape (E, B, D_out)."""
    E, D_in, H = w1.shape
    _, _, D_out = w2.shape
    B = x.shape[0]
    out_dtype = x.dtype
    feed_dtype = jnp.dtype(mxu_dtype) if mxu_dtype is not None else jnp.dtype(x.dtype)
    feed_isz = feed_dtype.itemsize
    out_isz = jnp.dtype(out_dtype).itemsize

    Hp = _round_up(H, 128)
    Dinp = _round_up(D_in, 128)
    Dp = _round_up(D_out, 128)

    b_tile = _pick_b_tile(B, b_tile)
    Bp = _round_up(B, b_tile)
    grid = (Bp // b_tile,)

    # ---- layout plumbing (pure JAX, outside the kernel) ----
    w1p = jnp.pad(w1, ((0, 0), (0, Dinp - D_in), (0, Hp - H))).astype(feed_dtype)
    w1_cat = jnp.transpose(w1p, (1, 0, 2)).reshape(Dinp, E * Hp)       # (Dinp, E*Hp)
    b1_cat = jnp.pad(b1, ((0, 0), (0, 0), (0, Hp - H))) \
                .reshape(1, E * Hp).astype(jnp.float32)                # (1, E*Hp)
    xp = jnp.pad(x, ((0, Bp - B), (0, Dinp - D_in))).astype(feed_dtype)

    # Block-diagonal layer 2 is flop-neutral (and output-byte much smaller)
    # whenever all members' outputs fit one padded lane group.
    use_blockdiag = (E * D_out) <= Dp

    scratch = [pltpu.VMEM((b_tile, E * Hp), feed_dtype)]

    # True (unpadded) cost for XLA's scheduler.
    cost = pl.CostEstimate(
        flops=2 * B * E * (D_in * H + H * D_out),
        transcendentals=0,
        bytes_accessed=(B * D_in + E * (D_in * H + H + H * D_out + D_out)
                        + E * B * D_out) * feed_isz,
    )

    if use_blockdiag:
        Np = _round_up(E * D_out, 128)
        w2_bd = jnp.zeros((E * Hp, Np), feed_dtype)
        for e in range(E):
            w2_bd = w2_bd.at[e * Hp:e * Hp + H,
                             e * D_out:(e + 1) * D_out].set(w2[e].astype(feed_dtype))
        b2_cat = jnp.pad(b2.reshape(1, E * D_out),
                         ((0, 0), (0, Np - E * D_out))).astype(jnp.float32)

        in_specs = [
            pl.BlockSpec((b_tile, Dinp), lambda i: (i, 0)),     # x: tiled over batch
            pl.BlockSpec((Dinp, E * Hp), lambda i: (0, 0)),     # weights: resident
            pl.BlockSpec((1, E * Hp), lambda i: (0, 0)),
            pl.BlockSpec((E * Hp, Np), lambda i: (0, 0)),
            pl.BlockSpec((1, Np), lambda i: (0, 0)),
        ]
        out_specs = pl.BlockSpec((b_tile, Np), lambda i: (i, 0))
        out_shape = jax.ShapeDtypeStruct((Bp, Np), out_dtype)
        kernel = _ensemble_blockdiag_kernel
        args = (xp, w1_cat, b1_cat, w2_bd, b2_cat)

        resident = (2 * b_tile * Dinp * feed_isz
                    + 2 * b_tile * Np * out_isz
                    + 2 * (Dinp * E * Hp + E * Hp * Np) * feed_isz
                    + 2 * (E * Hp + Np) * 4
                    + b_tile * E * Hp * feed_isz)
    else:
        w2p = jnp.pad(w2, ((0, 0), (0, Hp - H), (0, Dp - D_out))).astype(feed_dtype)
        b2p = jnp.pad(b2, ((0, 0), (0, 0), (0, Dp - D_out))).astype(jnp.float32)

        in_specs = [
            pl.BlockSpec((b_tile, Dinp), lambda i: (i, 0)),
            pl.BlockSpec((Dinp, E * Hp), lambda i: (0, 0)),
            pl.BlockSpec((1, E * Hp), lambda i: (0, 0)),
            pl.BlockSpec((E, Hp, Dp), lambda i: (0, 0, 0)),
            pl.BlockSpec((E, 1, Dp), lambda i: (0, 0, 0)),
        ]
        # Output produced directly in (E, B, Dp) layout — no wrapper transpose.
        out_specs = pl.BlockSpec((E, b_tile, Dp), lambda i: (0, i, 0))
        out_shape = jax.ShapeDtypeStruct((E, Bp, Dp), out_dtype)
        kernel = functools.partial(_ensemble_permember_kernel,
                                   n_members=E, hp=Hp)
        args = (xp, w1_cat, b1_cat, w2p, b2p)

        resident = (2 * b_tile * Dinp * feed_isz
                    + 2 * E * b_tile * Dp * out_isz
                    + 2 * (Dinp * E * Hp + E * Hp * Dp) * feed_isz
                    + 2 * (E * Hp + E * Dp) * 4
                    + b_tile * E * Hp * feed_isz)

    need = resident + (4 << 20)
    vmem_limit = int(min(need, 127 << 20)) if need > (32 << 20) else None

    grid_spec = pltpu.PrefetchScalarGridSpec(
        num_scalar_prefetch=0,
        grid=grid,
        in_specs=in_specs,
        out_specs=out_specs,
        scratch_shapes=scratch,
    )

    out_raw = pl.pallas_call(
        kernel,
        out_shape=out_shape,
        grid_spec=grid_spec,
        compiler_params=pltpu.CompilerParams(
            dimension_semantics=("parallel",),
            vmem_limit_bytes=vmem_limit),
        cost_estimate=cost,
    )(*args)

    if use_blockdiag:
        # Tiny unflatten: only E*D_out real lanes per row.
        out = (out_raw[:B, :E * D_out]
               .reshape(B, E, D_out)
               .transpose(1, 0, 2))
    else:
        out = out_raw[:, :B, :D_out]
    return out


def ensemble_forward_ref(x, w1, b1, w2, b2):
    """Pure-JAX reference mirroring torch.vmap(fn, in_dims=(0, 0, None))."""
    h = jnp.einsum("bd,edh->ebh", x, w1, precision="highest") + b1   # (E, B, H)
    h = jnp.maximum(h, 0.0)
    return jnp.einsum("ebh,eho->ebo", h, w2, precision="highest") + b2


if __name__ == "__main__":
    def make(E, B, D_in, H, D_out, key):
        kx, k1, k2, k3, k4 = jax.random.split(key, 5)
        x = jax.random.normal(kx, (B, D_in), dtype=jnp.float32)
        w1 = jax.random.normal(k1, (E, D_in, H), dtype=jnp.float32) * 0.1
        b1 = jax.random.normal(k2, (E, 1, H), dtype=jnp.float32) * 0.1
        w2 = jax.random.normal(k3, (E, H, D_out), dtype=jnp.float32) * 0.1
        b2 = jax.random.normal(k4, (E, 1, D_out), dtype=jnp.float32) * 0.1
        return x, w1, b1, w2, b2

    key_a, key_b = jax.random.split(jax.random.PRNGKey(0))

    # Path A: small per-member output -> block-diagonal fused layer 2.
    E, B, D_in, H, D_out = 4, 32, 32, 32, 8
    args_a = make(E, B, D_in, H, D_out, key_a)
    out_a = jax.block_until_ready(ensemble_forward(*args_a))
    ref_a = ensemble_forward_ref(*args_a)
    assert out_a.shape == (E, B, D_out), out_a.shape
    assert jnp.allclose(out_a, ref_a, atol=5e-4, rtol=5e-4), "mismatch (blockdiag path)"

    # Path B: wide per-member output -> per-member loop, (E, B, Dp) output.
    E, B, D_in, H, D_out = 2, 24, 48, 40, 160
    args_b = make(E, B, D_in, H, D_out, key_b)
    out_b = jax.block_until_ready(ensemble_forward(*args_b))
    ref_b = ensemble_forward_ref(*args_b)
    assert out_b.shape == (E, B, D_out), out_b.shape
    assert jnp.allclose(out_b, ref_b, atol=5e-4, rtol=5e-4), "mismatch (per-member path)"

    print("KERNEL_OK")
</pallas_src>

<mosaic_0001>
module attributes {stable_mosaic.version = 11 : i64} {
  func.func @_ensemble_blockdiag_kernel(%arg0: i32, %arg1: memref<16x128xf32, #tpu.memory_space<vmem>>, %arg2: memref<128x512xf32, #tpu.memory_space<vmem>>, %arg3: memref<1x512xf32, #tpu.memory_space<vmem>>, %arg4: memref<512x128xf32, #tpu.memory_space<vmem>>, %arg5: memref<1x128xf32, #tpu.memory_space<vmem>>, %arg6: memref<16x128xf32, #tpu.memory_space<vmem>>, %arg7: memref<16x512xf32, #tpu.memory_space<vmem>>) attributes {dimension_semantics = [#tpu.dimension_semantics<parallel>], iteration_bounds = array<i64: 2>, scalar_prefetch = 0 : i64, scratch_operands = 1 : i64, tpu.core_type = #tpu.core_type<tc>, window_params = [{transform_indices = @transform_0, window_bounds = array<i64: 16, 128>}, {pipeline_mode = #tpu.pipeline_mode<synchronous>, transform_indices = @transform_1, window_bounds = array<i64: 128, 512>}, {pipeline_mode = #tpu.pipeline_mode<synchronous>, transform_indices = @transform_2, window_bounds = array<i64: 1, 512>}, {pipeline_mode = #tpu.pipeline_mode<synchronous>, transform_indices = @transform_3, window_bounds = array<i64: 512, 128>}, {pipeline_mode = #tpu.pipeline_mode<synchronous>, transform_indices = @transform_4, window_bounds = array<i64: 1, 128>}, {transform_indices = @transform_5, window_bounds = array<i64: 16, 128>}]} {
    %c0 = arith.constant 0 : index
    %c0_0 = arith.constant 0 : index
    %0 = vector.load %arg1[%c0, %c0_0] : memref<16x128xf32, #tpu.memory_space<vmem>>, vector<16x128xf32>
    %c0_1 = arith.constant 0 : index
    %c0_2 = arith.constant 0 : index
    %1 = vector.load %arg2[%c0_1, %c0_2] : memref<128x512xf32, #tpu.memory_space<vmem>>, vector<128x512xf32>
    %cst = arith.constant dense<0.000000e+00> : vector<16x512xf32>
    %2 = tpu.matmul %0, %1, %cst {dimension_numbers = #tpu.dot_dimension_numbers<[1], [0], [0], [1], [0, 0, 1, 1], [], []>} : vector<16x128xf32>, vector<128x512xf32>, vector<16x512xf32> -> vector<16x512xf32>
    %c0_3 = arith.constant 0 : index
    %c0_4 = arith.constant 0 : index
    %3 = vector.load %arg3[%c0_3, %c0_4] : memref<1x512xf32, #tpu.memory_space<vmem>>, vector<1x512xf32>
    %4 = vector.broadcast %3 : vector<1x512xf32> to vector<16x512xf32>
    %5 = arith.addf %2, %4 : vector<16x512xf32>
    %cst_5 = arith.constant 0.000000e+00 : f32
    %6 = vector.broadcast %cst_5 : f32 to vector<16x512xf32>
    %7 = arith.maximumf %5, %6 : vector<16x512xf32>
    %c0_6 = arith.constant 0 : index
    %c0_7 = arith.constant 0 : index
    %8 = vector.load %arg7[%c0_6, %c0_7] : memref<16x512xf32, #tpu.memory_space<vmem>>, vector<16x512xf32>
    tpu.vector_store %arg7[%c0_6, %c0_7], %7 {strides = array<i32>} : memref<16x512xf32, #tpu.memory_space<vmem>>, vector<16x512xf32>,
    %c0_8 = arith.constant 0 : index
    %c0_9 = arith.constant 0 : index
    %9 = vector.load %arg7[%c0_8, %c0_9] : memref<16x512xf32, #tpu.memory_space<vmem>>, vector<16x512xf32>
    %c0_10 = arith.constant 0 : index
    %c0_11 = arith.constant 0 : index
    %10 = vector.load %arg4[%c0_10, %c0_11] : memref<512x128xf32, #tpu.memory_space<vmem>>, vector<512x128xf32>
    %cst_12 = arith.constant dense<0.000000e+00> : vector<16x128xf32>
    %11 = tpu.matmul %9, %10, %cst_12 {dimension_numbers = #tpu.dot_dimension_numbers<[1], [0], [0], [1], [0, 0, 1, 1], [], []>} : vector<16x512xf32>, vector<512x128xf32>, vector<16x128xf32> -> vector<16x128xf32>
    %c0_13 = arith.constant 0 : index
    %c0_14 = arith.constant 0 : index
    %12 = vector.load %arg5[%c0_13, %c0_14] : memref<1x128xf32, #tpu.memory_space<vmem>>, vector<1x128xf32>
    %13 = vector.broadcast %12 : vector<1x128xf32> to vector<16x128xf32>
    %14 = arith.addf %11, %13 : vector<16x128xf32>
    %c0_15 = arith.constant 0 : index
    %c0_16 = arith.constant 0 : index
    %15 = vector.load %arg6[%c0_15, %c0_16] : memref<16x128xf32, #tpu.memory_space<vmem>>, vector<16x128xf32>
    tpu.vector_store %arg6[%c0_15, %c0_16], %14 {strides = array<i32>} : memref<16x128xf32, #tpu.memory_space<vmem>>, vector<16x128xf32>,
    return
  }
  func.func @transform_0(%arg0: i32) -> (i32, i32) {
    %c0_i32 = arith.constant 0 : i32
    %c0_i32_0 = arith.constant 0 : i32
    return %arg0, %c0_i32 : i32, i32
  }
  func.func @transform_1(%arg0: i32) -> (i32, i32) {
    %c0_i32 = arith.constant 0 : i32
    %c0_i32_0 = arith.constant 0 : i32
    %c0_i32_1 = arith.constant 0 : i32
    return %c0_i32, %c0_i32_0 : i32, i32
  }
  func.func @transform_2(%arg0: i32) -> (i32, i32) {
    %c0_i32 = arith.constant 0 : i32
    %c0_i32_0 = arith.constant 0 : i32
    %c0_i32_1 = arith.constant 0 : i32
    return %c0_i32, %c0_i32_0 : i32, i32
  }
  func.func @transform_3(%arg0: i32) -> (i32, i32) {
    %c0_i32 = arith.constant 0 : i32
    %c0_i32_0 = arith.constant 0 : i32
    %c0_i32_1 = arith.constant 0 : i32
    return %c0_i32, %c0_i32_0 : i32, i32
  }
  func.func @transform_4(%arg0: i32) -> (i32, i32) {
    %c0_i32 = arith.constant 0 : i32
    %c0_i32_0 = arith.constant 0 : i32
    %c0_i32_1 = arith.constant 0 : i32
    return %c0_i32, %c0_i32_0 : i32, i32
  }
  func.func @transform_5(%arg0: i32) -> (i32, i32) {
    %c0_i32 = arith.constant 0 : i32
    %c0_i32_0 = arith.constant 0 : i32
    return %arg0, %c0_i32 : i32, i32
  }
}

</mosaic_0001>

<bundles_post_ra>
// kernel: tpu_custom_call.1
= control target key start
LH: loop header
LB: loop body
LE: loop exit
PB: predicated region body
PF: predicated region fallthrough
CT: control target
= control target key end

     0   :  { %10 = vsyncpa [#allocation4], 0  ;;  %s1283_s0 = inlined_call_operand.hbm [shape: f32[32,128], index: 0, kind: input, shape index: {}]   ;;  %s1284_s1 = inlined_call_operand.hbm [shape: f32[128,512], index: 1, kind: input, shape index: {}]   ;;  %s1285_s2 = inlined_call_operand.hbm [shape: f32[1,512], index: 2, kind: input, shape index: {}]   ;;  %s1286_s3 = inlined_call_operand.hbm [shape: f32[512,128], index: 3, kind: input, shape index: {}]   ;;  %s1287_s4 = inlined_call_operand.vmem [shape: f32[1,128], index: 4, kind: input, shape index: {}]   ;;  %s1288_s5 = inlined_call_operand.hbm [shape: f32[32,128], index: 5, kind: output, shape index: {}]  }
   0x1   :  { %12 = vsyncpa [#allocation4 + $0x1], 0 }
   0x2   :  { %13 = vsyncpa [#allocation7], 0 }
   0x3   :  { %14 = vsyncpa [#allocation10], 0 }
   0x4   :  { %15 = vsyncpa [#allocation5], 0 }
   0x5   :  { %17 = vsyncpa [#allocation5 + $0x1], 0  ;;  %s1108_s18 = smov 0   ;;  %s1110_s19 = smov 0  }
   0x6   :  { %s1112_s20 = smov 0   ;;  %s1114_s21 = smov 0  }
   0x7 LB: > { %s1129_s22 = sadd.s32 4294967295, %s1067_s21   ;;  %s767_s23 = sadd.s32 4294967294, %s1067_s21   ;;  %s1067_s21 = sphi %s1114_s21, %s1301_s21   ;;  %s1063_s20 = sphi %s1112_s20, %s1300_s20   ;;  %s1059_s19 = sphi %s1110_s19, %s1299_s19   ;;  %s1055_s18 = sphi %s1108_s18, %s1298_s18  }
   0x8   : > { %p43_p0 = scmp.ne.s32.totalorder %s1059_s19, %s1055_s18  ;;  %p44_p1 = scmp.eq.s32.totalorder %s1129_s22, 0 }
   0x9   : > { %p151_p2 = scmp.eq.s32.totalorder %s1129_s22, 1  ;;  %p157_p3 = scmp.eq.s32.totalorder %s767_s23, 1 }
   0xa   : > { %p1138_p4 = por %p44_p1, %p43_p0  ;;  %p768_p5 = scmp.ge.s32.totalorder %s1067_s21, 1 }
   0xb   : > { %p1143_p6 = por %p157_p3, %p43_p0  ;;  %p164_p7 = scmp.lt.s32.totalorder %s1067_s21, 3 }
   0xc   : > { %s175_s28 = sshll.u32 %s1284_s1, 4  ;;  %s1069_s30 = smov [#allocation6]   ;;  %s176_s28 = int_to_ptr.hbm [resolvable:$true] %s175_s28 }
   0xd   : > { %p1151_p8 = pnand %p768_p5, %p164_p7  ;;  %s177_s6 = sshll.u32 %s1069_s30, 4  ;;  %s178_s6 = int_to_ptr.vmem [resolvable:$true] %s177_s6 }
   0xe   : > { %s190_s10 = sshll.u32 %s1285_s2, 4  ;;  %s1070_s11 = smov 512   ;;  %s191_s10 = int_to_ptr.hbm [resolvable:$true] %s190_s10 }
   0xf   : > { %p805_p9 = pneg %p1151_p8  ;;  %s1071_s12 = smov 32  }
  0x10   : > { %s1072_s13 = smov [#allocation8]   ;;  %s201_s17 = sshll.u32 %s1286_s3, 4  ;;  %s202_s17 = int_to_ptr.hbm [resolvable:$true] %s201_s17 }
  0x11   : > { %p1159_p10 = pnand %p805_p9, %p44_p1  ;;  %s192_s14 = sshll.u32 %s1072_s13, 4  ;;  %s193_s14 = int_to_ptr.vmem [resolvable:$true] %s192_s14 }
  0x12   : > { %s1073_s23 = smov [#allocation9]   ;;  %s1289_s27 = smov 128  }
  0x13   : > { %808 = dma.hbm_to_vmem [thread:$0]  (!%p1159_p10), %s176_s28, 8192, %s178_s6, [#allocation7], %s1070_s11, %s1070_s11, %s1071_s12  }
  0x14   : > { %811 = dma.hbm_to_vmem [thread:$0]  (!%p1159_p10), %s191_s10, 64, %s193_s14, [#allocation7]  }
  0x15   : > { %s203_s26 = sshll.u32 %s1073_s23, 4  ;;  %s1075_s28 = smov 8   ;;  %s204_s26 = int_to_ptr.vmem [resolvable:$true] %s203_s26 }
  0x16   : > { %814 = dma.hbm_to_vmem [thread:$0]  (!%p1159_p10), %s202_s17, 8192, %s204_s26, [#allocation10], %s1289_s27, %s1289_s27, %s1075_s28  }
  0x17   : > { %s1180_s30 = sadd.s32 1, %s1067_s21   ;;  %s30_s8 = sadd.s32 1, %s1063_s20 }
  0x18   : > { %s27_s6 = ssub.s32 %s1067_s21, %s1180_s30  ;;  %p37_p13 = scmp.ne.s32.totalorder %s1063_s20, %s1059_s19 }
  0x19   : > { %p28_p12 = scmp.eq.s32.totalorder %s27_s6, 0  ;;  %p38_p0 = scmp.eq.s32.totalorder %s1067_s21, 0 }
  0x1a   : > { %p1193_p3 = por %p151_p2, %p37_p13  ;;  %p826_p5 = scmp.lt.s32.totalorder %s1067_s21, 2 }
  0x1b   : > { %s1189_s9 = scalar_select %p28_p12, %s1063_s20, %s30_s8  }
  0x1c   : > { %s220_s7 = sand.u32 1, %s1063_s20   ;;  %s787_s11 = sshll.u32 %s1067_s21, 4 }
  0x1d   : > { %p39_p7 = por %p38_p0, %p37_p13  ;;  %s773_s12 = sshll.u32 %s220_s7, 4 }
  0x1e   : > { %s229_s15 = scalar_lea.hbm %s1283_s0, %s787_s11  ;;  %s224_s17 = scalar_lea.vmem [#allocation3], %s773_s12 }
  0x1f   : > { %s230_s16 = sshll.u32 %s229_s15, 4  ;;  %s232_s23 = sshll.u32 %s224_s17, 4  ;;  %s231_s16 = int_to_ptr.hbm [resolvable:$true] %s230_s16  ;;  %s233_s23 = int_to_ptr.vmem [resolvable:$true] %s232_s23 }
  0x20   : > { %p1203_p9 = pnand %p826_p5, %p39_p7  ;;  %s221_s6 = scalar_lea.sflag [#allocation4], %s220_s7 }
  0x21   : > { %s963_s8 = sshra.s32 %s231_s16, 4  ;;  %s970_s12 = scalar_lea.hbm %s1283_s0, 32  ;;  %s964_s8 = int_to_ptr.hbm [resolvable:$true] %s963_s8 }
  0x22   : > { %s965_s27 = scalar_lea.hbm %s964_s8, 16  ;;  %p967_p10 = pneg %p1203_p9 }
  0x23   : > { %p966_p2 = scmp.ne.s32.totalorder %s964_s8, %s965_s27  ;;  %p971_p0 = scmp.lt.s32.totalorder %s964_s8, %s1283_s0 }
  0x24   : > { %p972_p5 = scmp.lt.s32.totalorder %s970_s12, %s965_s27 }
  0x25   : > { %p968_p12 = pnand %p967_p10, %p966_p2 }
  0x26   : > { %p973_p7 = por %p972_p5, %p971_p0 }
  0x27   : > { %p969_p13 = pneg %p968_p12 }
  0x29   : > { %p974_p11 = pnand %p973_p7, %p969_p13 }
  0x2b   : > { %977 = shalt.err (!%p974_p11)
}
  0x2c   : > { %s1296_s7 = smov 128   ;;  %244 = sbr.rel (%p1151_p8) target bundleno = 370 (0x172), region = 40 }
  0x2d   : > { %818 = dma.hbm_to_vmem [thread:$0]  (!%p1203_p9), %s231_s16, 256, %s233_s23, %s221_s6, %s1296_s7, %s1296_s7, %s1075_s28  }
  0x2e   : > { %s1223_s17 = sand.u32 (!%p1151_p8), 1, %s1059_s19  }
  0x2f   : > { %s777_s27 = sshll.u32 (!%p1151_p8), %s1223_s17, 4  ;;  %s247_s8 = scalar_lea.sflag (!%p1151_p8), [#allocation4], %s1223_s17 }
  0x30   : > { %s1229_s11 = scalar_lea.vmem (!%p1151_p8), [#allocation3], %s777_s27 }
  0x31   : > { %1038 = dma.done.wait (%p1138_p4), %s247_s8, 256  }
  0x32   : > { %1040 = vsyncadd (%p1138_p4), %s247_s8, 4294967040 }
  0x33   : > { %1042 = dma.done.wait (%p44_p1), [#allocation7], 8256  }
  0x34   : > { %1044 = vsyncadd (%p44_p1), [#allocation7], 4294959040 }
  0x35   : > { %1046 = dma.done.wait (%p44_p1), [#allocation10], 8192  }
  0x36   : > { %1048 = vsyncadd (%p44_p1), [#allocation10], 4294959104  ;;  %v359_v0 = vld [vmem:[#allocation6 + $0x1f0] sm:$0xff]  ;;  %v360_v2 = vld [vmem:[#allocation6 + $0x1f8] sm:$0xff]  ;;  %s788_s28 = sshll.u32 %s1129_s22, 4  ;;  %s292_s6 = scalar_lea.vmem [#allocation11], %s777_s27 }
  0x37   : > { %v355_v1 = vld [vmem:[#allocation6 + $0x1d0] sm:$0xff]  ;;  %417 = vmatpush.msra.mxu2 %v359_v0  ;;  %440 = vmatpush.msra.mxu3 %v360_v2  ;;  %v356_v3 = vld [vmem:[#allocation6 + $0x1d8] sm:$0xff]  ;;  %v357_v6 = vld [vmem:[#allocation6 + $0x1e0] sm:$0xff]  ;;  %s661_s26 = scalar_lea.hbm %s1288_s5, %s788_s28  ;;  %s662_s13 = sshll.u32 %s292_s6, 4  ;;  %s663_s13 = int_to_ptr.vmem [resolvable:$true] %s662_s13 }
  0x38   : > { %v351_v4 = vld [vmem:[#allocation6 + $0x1b0] sm:$0xff]  ;;  %v352_v5 = vld [vmem:[#allocation6 + $0x1b8] sm:$0xff]  ;;  %v353_v7 = vld [vmem:[#allocation6 + $0x1c0] sm:$0xff]  ;;  %371 = vmatpush.msra.mxu0 %v357_v6  ;;  %s664_s12 = sshll.u32 %s661_s26, 4  ;;  %s650_s22 = scalar_lea.sflag [#allocation5], %s1223_s17  ;;  %s665_s12 = int_to_ptr.hbm [resolvable:$true] %s664_s12 }
  0x39   : > { %418 = vmatpush.msra.mxu2 %v355_v1  ;;  %441 = vmatpush.msra.mxu3 %v356_v3  ;;  %v358_v8 = vld [vmem:[#allocation6 + $0x1e8] sm:$0xff]  ;;  %v347_v9 = vld [vmem:[#allocation6 + $0x190] sm:$0xff]  ;;  %v348_v10 = vld [vmem:[#allocation6 + $0x198] sm:$0xff]  ;;  %s1007_s14 = sshra.s32 %s665_s12, 4  ;;  %s1013_s8 = scalar_lea.hbm %s1288_s5, 32  ;;  %s1008_s14 = int_to_ptr.hbm [resolvable:$true] %s1007_s14 }
  0x3a   : > { %394 = vmatpush.msra.mxu1 %v358_v8  ;;  %v349_v11 = vld [vmem:[#allocation6 + $0x1a0] sm:$0xff]  ;;  %v354_v12 = vld [vmem:[#allocation6 + $0x1c8] sm:$0xff]  ;;  %v343_v13 = vld [vmem:[#allocation6 + $0x170] sm:$0xff]  ;;  %372 = vmatpush.msra.mxu0 %v353_v7  ;;  %s1009_s15 = scalar_lea.hbm %s1008_s14, 16  ;;  %p1014_p11 = scmp.lt.s32.totalorder %s1008_s14, %s1288_s5 }
  0x3b   : > { %419 = vmatpush.msra.mxu2 %v351_v4  ;;  %442 = vmatpush.msra.mxu3 %v352_v5  ;;  %v344_v14 = vld [vmem:[#allocation6 + $0x178] sm:$0xff]  ;;  %v350_v15 = vld [vmem:[#allocation6 + $0x1a8] sm:$0xff]  ;;  %v345_v16 = vld [vmem:[#allocation6 + $0x180] sm:$0xff]  ;;  %p1010_p1 = scmp.ne.s32.totalorder %s1008_s14, %s1009_s15  ;;  %p1015_p9 = scmp.lt.s32.totalorder %s1013_s8, %s1009_s15 }
  0x3c   : > { %395 = vmatpush.msra.mxu1 %v354_v12  ;;  %v346_v17 = vld [vmem:[#allocation6 + $0x188] sm:$0xff]  ;;  %v339_v18 = vld [vmem:[#allocation6 + $0x150] sm:$0xff]  ;;  %373 = vmatpush.msra.mxu0 %v349_v11  ;;  %v340_v19 = vld [vmem:[#allocation6 + $0x158] sm:$0xff] }
  0x3d   : > { %420 = vmatpush.msra.mxu2 %v347_v9  ;;  %443 = vmatpush.msra.mxu3 %v348_v10  ;;  %v341_v20 = vld [vmem:[#allocation6 + $0x160] sm:$0xff]  ;;  %v342_v21 = vld [vmem:[#allocation6 + $0x168] sm:$0xff]  ;;  %v335_v22 = vld [vmem:[#allocation6 + $0x130] sm:$0xff]  ;;  %p1011_p4 = pnand %p1010_p1, %p1193_p3  ;;  %p1016_p2 = por %p1015_p9, %p1014_p11 }
  0x3e   : > { %396 = vmatpush.msra.mxu1 %v350_v15  ;;  %374 = vmatpush.msra.mxu0 %v345_v16  ;;  %v336_v23 = vld [vmem:[#allocation6 + $0x138] sm:$0xff]  ;;  %v337_v24 = vld [vmem:[#allocation6 + $0x140] sm:$0xff]  ;;  %v338_v25 = vld [vmem:[#allocation6 + $0x148] sm:$0xff] }
  0x3f   : > { %421 = vmatpush.msra.mxu2 %v343_v13  ;;  %444 = vmatpush.msra.mxu3 %v344_v14  ;;  %v331_v26 = vld [vmem:[#allocation6 + $0x110] sm:$0xff]  ;;  %v332_v27 = vld [vmem:[#allocation6 + $0x118] sm:$0xff]  ;;  %v333_v28 = vld [vmem:[#allocation6 + $0x120] sm:$0xff]  ;;  %p1012_p8 = pneg %p1011_p4 }
  0x40   : > { %397 = vmatpush.msra.mxu1 %v346_v17  ;;  %375 = vmatpush.msra.mxu0 %v341_v20  ;;  %v334_v29 = vld [vmem:[#allocation6 + $0x128] sm:$0xff]  ;;  %v327_v30 = vld [vmem:[#allocation6 + $0xf0] sm:$0xff]  ;;  %v328_v31 = vld [vmem:[#allocation6 + $0xf8] sm:$0xff] }
  0x41   : > { %422 = vmatpush.msra.mxu2 %v339_v18  ;;  %445 = vmatpush.msra.mxu3 %v340_v19  ;;  %v329_v32 = vld [vmem:[#allocation6 + $0x100] sm:$0xff]  ;;  %v330_v33 = vld [vmem:[#allocation6 + $0x108] sm:$0xff]  ;;  %v323_v34 = vld [vmem:[#allocation6 + $0xd0] sm:$0xff]  ;;  %p1017_p10 = pnand %p1016_p2, %p1012_p8 }
  0x42   : > { %398 = vmatpush.msra.mxu1 %v342_v21  ;;  %376 = vmatpush.msra.mxu0 %v337_v24  ;;  %v324_v35 = vld [vmem:[#allocation6 + $0xd8] sm:$0xff]  ;;  %v325_v36 = vld [vmem:[#allocation6 + $0xe0] sm:$0xff]  ;;  %v326_v37 = vld [vmem:[#allocation6 + $0xe8] sm:$0xff] }
  0x43   : > { %423 = vmatpush.msra.mxu2 %v335_v22  ;;  %446 = vmatpush.msra.mxu3 %v336_v23  ;;  %v319_v38 = vld [vmem:[#allocation6 + $0xb0] sm:$0xff]  ;;  %v320_v39 = vld [vmem:[#allocation6 + $0xb8] sm:$0xff]  ;;  %v321_v40 = vld [vmem:[#allocation6 + $0xc0] sm:$0xff] }
  0x44   : > { %399 = vmatpush.msra.mxu1 %v338_v25  ;;  %377 = vmatpush.msra.mxu0 %v333_v28  ;;  %v322_v41 = vld [vmem:[#allocation6 + $0xc8] sm:$0xff]  ;;  %v315_v42 = vld [vmem:[#allocation6 + $0x90] sm:$0xff]  ;;  %v316_v43 = vld [vmem:[#allocation6 + $0x98] sm:$0xff] }
  0x45   : > { %424 = vmatpush.msra.mxu2 %v331_v26  ;;  %447 = vmatpush.msra.mxu3 %v332_v27  ;;  %v317_v44 = vld [vmem:[#allocation6 + $0xa0] sm:$0xff]  ;;  %v318_v45 = vld [vmem:[#allocation6 + $0xa8] sm:$0xff]  ;;  %v311_v46 = vld [vmem:[#allocation6 + $0x70] sm:$0xff] }
  0x46   : > { %400 = vmatpush.msra.mxu1 %v334_v29  ;;  %378 = vmatpush.msra.mxu0 %v329_v32  ;;  %v312_v47 = vld [vmem:[#allocation6 + $0x78] sm:$0xff]  ;;  %v313_v48 = vld [vmem:[#allocation6 + $0x80] sm:$0xff]  ;;  %v314_v49 = vld [vmem:[#allocation6 + $0x88] sm:$0xff] }
  0x47   : > { %425 = vmatpush.msra.mxu2 %v327_v30  ;;  %448 = vmatpush.msra.mxu3 %v328_v31  ;;  %v307_v50 = vld [vmem:[#allocation6 + $0x50] sm:$0xff]  ;;  %v308_v51 = vld [vmem:[#allocation6 + $0x58] sm:$0xff]  ;;  %v309_v52 = vld [vmem:[#allocation6 + $0x60] sm:$0xff] }
  0x48   : > { %401 = vmatpush.msra.mxu1 %v330_v33  ;;  %379 = vmatpush.msra.mxu0 %v325_v36  ;;  %v310_v53 = vld [vmem:[#allocation6 + $0x68] sm:$0xff]  ;;  %v303_v54 = vld [vmem:[#allocation6 + $0x30] sm:$0xff]  ;;  %v304_v55 = vld [vmem:[#allocation6 + $0x38] sm:$0xff] }
  0x49   : > { %426 = vmatpush.msra.mxu2 %v323_v34  ;;  %449 = vmatpush.msra.mxu3 %v324_v35  ;;  %v305_v56 = vld [vmem:[#allocation6 + $0x40] sm:$0xff]  ;;  %v306_v57 = vld [vmem:[#allocation6 + $0x48] sm:$0xff]  ;;  %v299_v58 = vld [vmem:[#allocation6 + $0x10] sm:$0xff] }
  0x4a   : > { %402 = vmatpush.msra.mxu1 %v326_v37  ;;  %380 = vmatpush.msra.mxu0 %v321_v40  ;;  %v300_v59 = vld [vmem:[#allocation6 + $0x18] sm:$0xff]  ;;  %v295_v60 = vld [vmem:[%s1229_s11] sm:$0xff]  ;;  %v302_v62 = vld [vmem:[#allocation6 + $0x28] sm:$0xff] }
  0x4b   : > { %427 = vmatpush.msra.mxu2 %v319_v38  ;;  %450 = vmatpush.msra.mxu3 %v320_v39  ;;  %v301_v61 = vld [vmem:[#allocation6 + $0x20] sm:$0xff]  ;;  %v298_v2 = vld [vmem:[#allocation6 + $0x8] sm:$0xff]  ;;  %v533_v4 = vld [vmem:[#allocation9 + $0x170] sm:$0xff] }
  0x4c   : > { %403 = vmatpush.msra.mxu1 %v322_v41  ;;  %381 = vmatpush.msra.mxu0 %v317_v44  ;;  %v534_v63 = vld [vmem:[#allocation9 + $0x178] sm:$0xff]  ;;  %v549_v6 = vld [vmem:[#allocation9 + $0x1f0] sm:$0xff]  ;;  %v532_v8 = vld [vmem:[#allocation9 + $0x168] sm:$0xff] }
  0x4d   : > { %428 = vmatpush.msra.mxu2 %v315_v42  ;;  %451 = vmatpush.msra.mxu3 %v316_v43  ;;  %v550_v0 = vld [vmem:[#allocation9 + $0x1f8] sm:$0xff]  ;;  %v501_v7 = vld [vmem:[#allocation9 + $0x70] sm:$0xff]  ;;  %v500_v10 = vld [vmem:[#allocation9 + $0x68] sm:$0xff] }
  0x4e   : > { %404 = vmatpush.msra.mxu1 %v318_v45  ;;  %382 = vmatpush.msra.mxu0 %v313_v48  ;;  %v297_v1 = vld [vmem:[#allocation6] sm:$0xff]  ;;  %v296_v9 = vld [vmem:[%s1229_s11 + $0x8] sm:$0xff] }
  0x4f   : > { %429 = vmatpush.msra.mxu2 %v311_v46  ;;  %452 = vmatpush.msra.mxu3 %v312_v47  ;;  %v502_v3 = vld [vmem:[#allocation9 + $0x78] sm:$0xff]  ;;  %v517_v11 = vld [vmem:[#allocation9 + $0xf0] sm:$0xff]  ;;  %v531_v12 = vld [vmem:[#allocation9 + $0x160] sm:$0xff] }
  0x50   : > { %405 = vmatpush.msra.mxu1 %v314_v49  ;;  %383 = vmatpush.msra.mxu0 %v309_v52  ;;  %v518_v5 = vld [vmem:[#allocation9 + $0xf8] sm:$0xff]  ;;  %v548_v13 = vld [vmem:[#allocation9 + $0x1e8] sm:$0xff]  ;;  %v499_v14 = vld [vmem:[#allocation9 + $0x60] sm:$0xff] }
  0x51   : > { %430 = vmatpush.msra.mxu2 %v307_v50  ;;  %453 = vmatpush.msra.mxu3 %v308_v51  ;;  %v516_v15 = vld [vmem:[#allocation9 + $0xe8] sm:$0xff]  ;;  %v530_v16 = vld [vmem:[#allocation9 + $0x158] sm:$0xff]  ;;  %v547_v17 = vld [vmem:[#allocation9 + $0x1e0] sm:$0xff] }
  0x52   : > { %406 = vmatpush.msra.mxu1 %v310_v53  ;;  %384 = vmatpush.msra.mxu0 %v305_v56  ;;  %v498_v18 = vld [vmem:[#allocation9 + $0x58] sm:$0xff]  ;;  %v515_v19 = vld [vmem:[#allocation9 + $0xe0] sm:$0xff]  ;;  %v529_v20 = vld [vmem:[#allocation9 + $0x150] sm:$0xff] }
  0x53   : > { %431 = vmatpush.msra.mxu2 %v303_v54  ;;  %454 = vmatpush.msra.mxu3 %v304_v55  ;;  %v546_v21 = vld [vmem:[#allocation9 + $0x1d8] sm:$0xff]  ;;  %v497_v22 = vld [vmem:[#allocation9 + $0x50] sm:$0xff]  ;;  %v528_v24 = vld [vmem:[#allocation9 + $0x148] sm:$0xff] }
  0x54   : > { %407 = vmatpush.msra.mxu1 %v306_v57  ;;  %385 = vmatpush.msra.mxu0 %v301_v61  ;;  %v514_v23 = vld [vmem:[#allocation9 + $0xd8] sm:$0xff]  ;;  %v545_v25 = vld [vmem:[#allocation9 + $0x1d0] sm:$0xff]  ;;  %v496_v26 = vld [vmem:[#allocation9 + $0x48] sm:$0xff] }
  0x55   : > { %432 = vmatpush.msra.mxu2 %v299_v58  ;;  %455 = vmatpush.msra.mxu3 %v300_v59  ;;  %v513_v27 = vld [vmem:[#allocation9 + $0xd0] sm:$0xff]  ;;  %v527_v28 = vld [vmem:[#allocation9 + $0x140] sm:$0xff]  ;;  %v544_v29 = vld [vmem:[#allocation9 + $0x1c8] sm:$0xff] }
  0x56   : > { %433 = vmatmul.f32.vlgmr.msra.gmra.mxu2 %v295_v60  ;;  %456 = vmatmul.f32.vlgmr.msra.gmra.mxu3 %v295_v60  ;;  %v495_v30 = vld [vmem:[#allocation9 + $0x40] sm:$0xff]  ;;  %v512_v31 = vld [vmem:[#allocation9 + $0xc8] sm:$0xff]  ;;  %v526_v32 = vld [vmem:[#allocation9 + $0x138] sm:$0xff] }
  0x57   : > { %408 = vmatpush.msra.mxu1 %v302_v62  ;;  %601 = vmatpush.msrb.mxu2 %v534_v63  ;;  %v543_v33 = vld [vmem:[#allocation9 + $0x1c0] sm:$0xff]  ;;  %v494_v34 = vld [vmem:[#allocation9 + $0x38] sm:$0xff]  ;;  %v525_v36 = vld [vmem:[#allocation9 + $0x130] sm:$0xff] }
  0x58   : > { %624 = vmatpush.msrb.mxu3 %v550_v0  ;;  %386 = vmatpush.msra.mxu0 %v297_v1  ;;  %v511_v35 = vld [vmem:[#allocation9 + $0xc0] sm:$0xff]  ;;  %v542_v37 = vld [vmem:[#allocation9 + $0x1b8] sm:$0xff]  ;;  %v493_v38 = vld [vmem:[#allocation9 + $0x30] sm:$0xff] }
  0x59   : > { %409 = vmatpush.msra.mxu1 %v298_v2  ;;  %387 = vmatmul.f32.vlgmr.msra.gmra.mxu0 %v295_v60  ;;  %v510_v39 = vld [vmem:[#allocation9 + $0xb8] sm:$0xff]  ;;  %v524_v40 = vld [vmem:[#allocation9 + $0x128] sm:$0xff]  ;;  %v541_v41 = vld [vmem:[#allocation9 + $0x1b0] sm:$0xff] }
  0x5a   : > { %410 = vmatmul.f32.vlgmr.msra.gmra.mxu1 %v295_v60  ;;  %555 = vmatpush.msrb.mxu0 %v502_v3  ;;  %v492_v42 = vld [vmem:[#allocation9 + $0x28] sm:$0xff]  ;;  %v509_v43 = vld [vmem:[#allocation9 + $0xb0] sm:$0xff]  ;;  %v523_v44 = vld [vmem:[#allocation9 + $0x120] sm:$0xff] }
  0x5b   : > { %602 = vmatpush.msrb.mxu2 %v533_v4  ;;  %578 = vmatpush.msrb.mxu1 %v518_v5  ;;  %v540_v45 = vld [vmem:[#allocation9 + $0x1a8] sm:$0xff]  ;;  %v491_v46 = vld [vmem:[#allocation9 + $0x20] sm:$0xff]  ;;  %v522_v48 = vld [vmem:[#allocation9 + $0x118] sm:$0xff] }
  0x5c   : > { %625 = vmatpush.msrb.mxu3 %v549_v6  ;;  %556 = vmatpush.msrb.mxu0 %v501_v7  ;;  %v508_v47 = vld [vmem:[#allocation9 + $0xa8] sm:$0xff]  ;;  %v539_v49 = vld [vmem:[#allocation9 + $0x1a0] sm:$0xff]  ;;  %v490_v50 = vld [vmem:[#allocation9 + $0x18] sm:$0xff] }
  0x5d   : > { %603 = vmatpush.msrb.mxu2 %v532_v8  ;;  %579 = vmatpush.msrb.mxu1 %v517_v11  ;;  %v507_v51 = vld [vmem:[#allocation9 + $0xa0] sm:$0xff]  ;;  %v521_v52 = vld [vmem:[#allocation9 + $0x110] sm:$0xff]  ;;  %v538_v53 = vld [vmem:[#allocation9 + $0x198] sm:$0xff] }
  0x5e   : > { %436 = vmatmul.f32.gmra.mxu2 %v296_v9  ;;  %459 = vmatmul.f32.gmra.mxu3 %v296_v9  ;;  %v489_v54 = vld [vmem:[#allocation9 + $0x10] sm:$0xff]  ;;  %v506_v55 = vld [vmem:[#allocation9 + $0x98] sm:$0xff]  ;;  %v520_v56 = vld [vmem:[#allocation9 + $0x108] sm:$0xff] }
  0x5f   : > { %557 = vmatpush.msrb.mxu0 %v500_v10  ;;  %604 = vmatpush.msrb.mxu2 %v531_v12  ;;  %v537_v57 = vld [vmem:[#allocation9 + $0x190] sm:$0xff]  ;;  %v488_v58 = vld [vmem:[#allocation9 + $0x8] sm:$0xff]  ;;  %v519_v60 = vld [vmem:[#allocation9 + $0x100] sm:$0xff] }
  0x60   : > { %626 = vmatpush.msrb.mxu3 %v548_v13  ;;  %580 = vmatpush.msrb.mxu1 %v516_v15  ;;  %v505_v59 = vld [vmem:[#allocation9 + $0x90] sm:$0xff]  ;;  %v536_v61 = vld [vmem:[#allocation9 + $0x188] sm:$0xff]  ;;  %v487_v62 = vld [vmem:[#allocation9] sm:$0xff] }
  0x61   : > { %558 = vmatpush.msrb.mxu0 %v499_v14  ;;  %605 = vmatpush.msrb.mxu2 %v530_v16  ;;  %v504_v63 = vld [vmem:[#allocation9 + $0x88] sm:$0xff]  ;;  %v535_v0 = vld [vmem:[#allocation9 + $0x180] sm:$0xff]  ;;  %v361_v2 = vld [vmem:[#allocation8] sm:$0xf] }
  0x62   : > { %390 = vmatmul.f32.gmra.mxu0 %v296_v9  ;;  %413 = vmatmul.f32.gmra.mxu1 %v296_v9  ;;  %v503_v1 = vld [vmem:[#allocation9 + $0x80] sm:$0xff]  ;;  %v363_v3 = vperm.slane %v361_v2, 0  ;;  %v364_v4 = vperm.slane %v361_v2, 1  ;;  %v365_v5 = vperm.slane %v361_v2, 2  ;;  %v366_v6 = vperm.slane %v361_v2, 3 }
  0x63   : > { %627 = vmatpush.msrb.mxu3 %v547_v17  ;;  %559 = vmatpush.msrb.mxu0 %v498_v18 }
  0x64   : > { %581 = vmatpush.msrb.mxu1 %v515_v19  ;;  %606 = vmatpush.msrb.mxu2 %v529_v20 }
  0x65   : > { %628 = vmatpush.msrb.mxu3 %v546_v21  ;;  %560 = vmatpush.msrb.mxu0 %v497_v22 }
  0x66   : > { %582 = vmatpush.msrb.mxu1 %v514_v23  ;;  %607 = vmatpush.msrb.mxu2 %v528_v24 }
  0x67   : > { %629 = vmatpush.msrb.mxu3 %v545_v25  ;;  %561 = vmatpush.msrb.mxu0 %v496_v26 }
  0x68   : > { %583 = vmatpush.msrb.mxu1 %v513_v27  ;;  %608 = vmatpush.msrb.mxu2 %v527_v28 }
  0x69   : > { %630 = vmatpush.msrb.mxu3 %v544_v29  ;;  %562 = vmatpush.msrb.mxu0 %v495_v30 }
  0x6a   : > { %584 = vmatpush.msrb.mxu1 %v512_v31  ;;  %609 = vmatpush.msrb.mxu2 %v526_v32  ;;  %v872_v31 = vld [vmem:[%s1287_s4] ss:$0 sm:$0xff] }
  0x6b   : > { %631 = vmatpush.msrb.mxu3 %v543_v33  ;;  %563 = vmatpush.msrb.mxu0 %v494_v34 }
  0x6c   : > { %585 = vmatpush.msrb.mxu1 %v511_v35  ;;  %610 = vmatpush.msrb.mxu2 %v525_v36 }
  0x6d   : > { %632 = vmatpush.msrb.mxu3 %v542_v37  ;;  %564 = vmatpush.msrb.mxu0 %v493_v38 }
  0x6e   : > { %586 = vmatpush.msrb.mxu1 %v510_v39  ;;  %611 = vmatpush.msrb.mxu2 %v524_v40 }
  0x6f   : > { %633 = vmatpush.msrb.mxu3 %v541_v41  ;;  %565 = vmatpush.msrb.mxu0 %v492_v42 }
  0x70   : > { %587 = vmatpush.msrb.mxu1 %v509_v43  ;;  %612 = vmatpush.msrb.mxu2 %v523_v44 }
  0x71   : > { %634 = vmatpush.msrb.mxu3 %v540_v45  ;;  %566 = vmatpush.msrb.mxu0 %v491_v46 }
  0x72   : > { %588 = vmatpush.msrb.mxu1 %v508_v47  ;;  %613 = vmatpush.msrb.mxu2 %v522_v48 }
  0x73   : > { %635 = vmatpush.msrb.mxu3 %v539_v49  ;;  %567 = vmatpush.msrb.mxu0 %v490_v50 }
  0x74   : > { %589 = vmatpush.msrb.mxu1 %v507_v51  ;;  %614 = vmatpush.msrb.mxu2 %v521_v52 }
  0x75   : > { %636 = vmatpush.msrb.mxu3 %v538_v53  ;;  %568 = vmatpush.msrb.mxu0 %v489_v54 }
  0x76   : > { %590 = vmatpush.msrb.mxu1 %v506_v55  ;;  %615 = vmatpush.msrb.mxu2 %v520_v56 }
  0x77   : > { %637 = vmatpush.msrb.mxu3 %v537_v57  ;;  %569 = vmatpush.msrb.mxu0 %v488_v58 }
  0x78   : > { %591 = vmatpush.msrb.mxu1 %v505_v59  ;;  %616 = vmatpush.msrb.mxu2 %v519_v60 }
  0x79   : > { %638 = vmatpush.msrb.mxu3 %v536_v61  ;;  %570 = vmatpush.msrb.mxu0 %v487_v62 }
  0x7a   : > { %592 = vmatpush.msrb.mxu1 %v504_v63 }
  0x7b   : > { %639 = vmatpush.msrb.mxu3 %v535_v0 }
  0x7c   : > { %593 = vmatpush.msrb.mxu1 %v503_v1 }
  0xd6   : > { %v388_v7 = vpop.f32.mrf.mxu0 }
  0xd7   : > { %v411_v8 = vpop.f32.mrf.mxu1  ;;  %v389_v9 = vadd.f32 %v388_v7, %v363_v3 }
  0xd8   : > { %v412_v10 = vadd.f32 %v411_v8, %v364_v4 }
  0xd9   : > { %v434_v11 = vpop.f32.mrf.mxu2  ;;  %v457_v12 = vpop.f32.mrf.mxu3  ;;  %v463_v14 = vmax.f32 %v389_v9, 0.0 }
  0xda   : > { %v435_v13 = vadd.f32 %v434_v11, %v365_v5  ;;  %v458_v15 = vadd.f32 %v457_v12, %v366_v6  ;;  %v464_v16 = vmax.f32 %v412_v10, 0.0 }
  0xdb   : > { %571 = vmatmul.f32.vlgmr.msrb.gmra.mxu0 %v463_v14 }
  0xdc   : > { %v465_v17 = vmax.f32 %v435_v13, 0.0  ;;  %v466_v18 = vmax.f32 %v458_v15, 0.0  ;;  %594 = vmatmul.f32.vlgmr.msrb.gmra.mxu1 %v464_v16 }
  0xde   : > { %617 = vmatmul.f32.vlgmr.msrb.gmra.mxu2 %v465_v17  ;;  %640 = vmatmul.f32.vlgmr.msrb.gmra.mxu3 %v466_v18 }
  0xdf   : > { %v391_v19 = vpop.f32.mrf.mxu0  ;;  %v414_v20 = vpop.f32.mrf.mxu1 }
  0xe0   : > { %v392_v21 = vadd.f32 %v391_v19, %v363_v3  ;;  %v415_v22 = vadd.f32 %v414_v20, %v364_v4 }
  0xe1   : > { %v437_v23 = vpop.f32.mrf.mxu2  ;;  %v460_v24 = vpop.f32.mrf.mxu3 }
  0xe2   : > { %v438_v25 = vadd.f32 %v437_v23, %v365_v5  ;;  %v467_v26 = vmax.f32 %v392_v21, 0.0  ;;  %v461_v27 = vadd.f32 %v460_v24, %v366_v6  ;;  %v468_v28 = vmax.f32 %v415_v22, 0.0 }
  0xe4   : > { %v469_v29 = vmax.f32 %v438_v25, 0.0  ;;  %v470_v30 = vmax.f32 %v461_v27, 0.0  ;;  %574 = vmatmul.f32.gmra.mxu0 %v467_v26  ;;  %597 = vmatmul.f32.gmra.mxu1 %v468_v28 }
  0xe6   : > { %620 = vmatmul.f32.gmra.mxu2 %v469_v29  ;;  %643 = vmatmul.f32.gmra.mxu3 %v470_v30 }
 0x158   : > { %v572_v32 = vpop.f32.mrf.mxu0 }
 0x159   : > { %v595_v33 = vpop.f32.mrf.mxu1  ;;  %v573_v34 = vadd.f32 %v872_v31, %v572_v32 }
 0x15b   : > { %v596_v35 = vadd.f32 %v595_v33, %v573_v34 }
 0x161   : > { %v618_v36 = vpop.f32.mrf.mxu2  ;;  %v641_v37 = vpop.f32.mrf.mxu3 }
 0x162   : > { %v619_v38 = vadd.f32 %v618_v36, %v596_v35  ;;  %v575_v39 = vpop.f32.mrf.mxu0  ;;  %v598_v41 = vpop.f32.mrf.mxu1 }
 0x163   : > { %v576_v40 = vadd.f32 %v872_v31, %v575_v39 }
 0x164   : > { %v642_v42 = vadd.f32 %v641_v37, %v619_v38 }
 0x165   : > { %v599_v43 = vadd.f32 %v598_v41, %v576_v40 }
 0x166   : > { %647 = vst [vmem:[%s292_s6] sm:$0xff] %v642_v42 }
 0x169   : > { %v621_v44 = vpop.f32.mrf.mxu2  ;;  %v644_v45 = vpop.f32.mrf.mxu3 }
 0x16a   : > { %v622_v46 = vadd.f32 %v621_v44, %v599_v43 }
 0x16c   : > { %v645_v47 = vadd.f32 %v644_v45, %v622_v46 }
 0x16e   : > { %648 = vst [vmem:[%s292_s6 + $0x8] sm:$0xff] %v645_v47 }
 0x16f   : > { %1020 = shalt.err (!%p1017_p10)
}
 0x170   : > { %s1076_s17 = smov 128   ;;  %s1077_s29 = smov 8  }
 0x171   : > { %803 = dma.vmem_to_hbm [thread:$0]  (%p1193_p3), %s663_s13, 256, %s665_s12, %s650_s22, %s1076_s17, %s1076_s17, %s1077_s29  }
 0x172 PF: > { %s679_s28 = sand.u32 1, %s1055_s18   ;;  %p1297_p12 = scmp.ge.s32.totalorder %s1067_s21, 2 }
 0x173   : > { %s680_s16 = scalar_lea.sflag [#allocation5], %s679_s28 }
 0x174   : > { %p820_p13 = pnand %p1297_p12, %p1143_p6 }
 0x176   : > { %p821_p0 = pneg %p820_p13 }
 0x178   : > { %1050 = dma.done.wait (%p821_p0), %s680_s16, 256  }
 0x179   : > { %1052 = vsyncadd (%p821_p0), %s680_s16, 4294967040  ;;  %p20_p5 = scmp.ge.s32.totalorder %s1180_s30, 4   ;;  %s1298_s18 = smov %s1059_s19 }
 0x17a   : > { %s1299_s19 = smov %s1063_s20  ;;  %s1300_s20 = smov %s1189_s9 }
 0x17b   : > { %s1301_s21 = smov %s1180_s30  ;;  %22 = sbr.rel (!%p20_p5) target bundleno = 7 (0x7), region = 97 }
 0x180   :  { %686 = vsyncpa [#allocation4], 1 }
 0x181   :  { %688 = vsyncpa [#allocation4 + $0x1], 1 }
 0x182   :  { %689 = vsyncpa [#allocation7], 1 }
 0x183   :  { %690 = vsyncpa [#allocation10], 1 }
 0x184   :  { %691 = vsyncpa [#allocation5], 1 }
 0x185   :  { %693 = vsyncpa [#allocation5 + $0x1], 1 }

</bundles_post_ra>
